<compile_context>
chip_gen: v5e
topology: v5e:2x2
jax: 0.10.0
libtpu: 0.0.40
codegen_flags: <defaults>
</compile_context>

<pallas_src>
import numpy as np
import jax
import jax.numpy as jnp
from jax.experimental import pallas as pl
from jax.experimental.pallas import tpu as pltpu

# ------------------------- small, module-consistent shapes -------------------------
B = 2        # batch
T = 4        # tbuffer
N1 = 6       # ncls1
N2 = 8       # ncls2
H = 16       # per-node feature width (last dim of x / hidden_state)
HID = 64     # hidden_dim hard-coded to 64 inside the module
M = B * T * H          # shared column (lane) space of both MLP stacks (= 128)
SLOPE = 0.01           # nn.LeakyReLU() default negative_slope
COL_BLOCK_MAX = 512    # lane-tile size once M outgrows a single block (v7x megacore)

_f32 = jnp.float32
_PREC = jax.lax.Precision.DEFAULT   # single bf16 MXU pass, f32 accumulation


def _leaky(v):
    return jnp.where(v > 0, v, SLOPE * v)


# --------------------------------- fused Pallas kernel ------------------------------
def lifter_fused_kernel(slab_ref, w1_ref, w2_ref, w3_ref, b23_ref, o_ref):
    """Whole Lifter forward on a transposed, lane-dense activation slab.

    slab : (3*N1+1, CB)  rows = [fe input (hs^T) | sm input | ones]; columns = (b,t,h)
    w1   : (128, 3*N1+1) both first Linear layers merged; bias folded via the ones row
    w2   : (64, 64)      SpatialMap hidden 64->64 layer (true shape, no zero padding)
    w3   : (8, 128)      both final Linear layers merged over stacked [h1_fe ; h2]
    b23  : (72, 1)       [sm_bb (64) ; fe_b2 + sm_bc (8)] lane-broadcast column
    o    : (N2, CB)      lane-dense output tile, columns = (b,t,h)
    """
    slab = slab_ref[...]                                                   # (3*N1+1, CB)

    # stage 1: both first Linear layers (+biases via ones row), one lane-dense matmul
    h1 = _leaky(jnp.dot(w1_ref[...], slab,
                        precision=_PREC, preferred_element_type=jnp.float32))   # (128, CB)

    # stage 2: SpatialMap 64->64 hidden layer; reads only the sm half of h1
    #          (static, sublane-aligned slice -> just vreg selection)
    h2 = _leaky(jnp.dot(w2_ref[...], h1[HID:, :],
                        precision=_PREC, preferred_element_type=jnp.float32)
                + b23_ref[:HID, :])                                              # (64, CB)

    # stage 3: both final Linear layers + the `spatial_out + embed` add, one matmul
    stacked = jnp.concatenate([h1[:HID, :], h2], axis=0)                         # (128, CB)
    o_ref[...] = (jnp.dot(w3_ref[...], stacked,
                          precision=_PREC, preferred_element_type=jnp.float32)
                  + b23_ref[HID:HID + N2, :])


# ------------------------------ parameter construction ------------------------------
def init_params(key):
    ks = iter(jax.random.split(key, 16))

    def lin(kin, kout, scale=0.05):
        return (scale * jax.random.normal(next(ks), (kin, kout), _f32),
                scale * jax.random.normal(next(ks), (kout,), _f32))

    # feature_embedder: Linear(N1,64) -> LeakyReLU -> Dropout -> Linear(64,N2)
    fe_w1, fe_b1 = lin(N1, HID)
    fe_w2, fe_b2 = lin(HID, N2)
    # SpatialMap.spt_module (dbl=True): Linear(2*N1,64) -> LeakyReLU -> Linear(64,64)
    #                                   -> LeakyReLU -> Dropout -> Linear(64,N2)
    sm_wa, sm_ba = lin(2 * N1, HID)
    sm_wb, sm_bb = lin(HID, HID)
    sm_wc, sm_bc = lin(HID, N2)

    # ---- transposed / merged packing for the fused kernel (once at init) ----
    # stage 1: rows 0:64 = fe outputs, rows 64:128 = sm outputs; last column = bias
    w1 = jnp.zeros((2 * HID, 3 * N1 + 1), _f32)
    w1 = (w1.at[:HID, :N1].set(fe_w1.T)
            .at[HID:, N1:3 * N1].set(sm_wa.T)
            .at[:HID, 3 * N1].set(fe_b1)
            .at[HID:, 3 * N1].set(sm_ba))
    # stage 2: true-shape SpatialMap hidden layer
    w2 = sm_wb.T                                                       # (64, 64)
    # stage 3: merged final layers acting on stacked [h1_fe ; h2]
    w3 = jnp.concatenate([fe_w2.T, sm_wc.T], axis=1)                   # (8, 128)
    # packed biases for stages 2 and 3 (b3 pre-summed)
    b23 = jnp.concatenate([sm_bb, fe_b2 + sm_bc])[:, None]             # (72, 1)

    packed = dict(w1=w1, w2=w2, w3=w3, b23=b23)
    raw = dict(fe_w1=fe_w1, fe_b1=fe_b1, fe_w2=fe_w2, fe_b2=fe_b2,
               sm_wa=sm_wa, sm_ba=sm_ba, sm_wb=sm_wb, sm_bb=sm_bb,
               sm_wc=sm_wc, sm_bc=sm_bc)
    return packed, raw


# ----------------------------------- forward pass ------------------------------------
def lifter_forward(params, x, hidden_state, y=None):
    """Lifter.forward with domain_embed=False, image_embed=True, eval-mode dropout.

    x, hidden_state: (B, T, N1, H).  Returns (B, T, N2, H).
    """
    # TODO(synk): `y` is only used inside the undefined lift_feature_vectors helper.
    del y
    B_, T_, N1_, H_ = x.shape
    M_ = B_ * T_ * H_
    K = 3 * N1_ + 1

    # -------- layout plumbing: ONE lane-dense (3*N1+1, M) slab crosses HBM --------
    # fe rows: hidden_state.transpose(2,3) equivalent, columns ordered (b,t,h)
    feT = jnp.transpose(hidden_state, (2, 0, 1, 3)).reshape(N1_, M_)
    # sm rows: concat((x, hidden), dim=1) -> permute(0,2,1) -> unflatten(2,(T,-1)),
    # transposed so the contraction axis (2*N1) sits on sublanes.
    # node_embed_abst == 0 (domain_embed=False), so the add is elided.
    xf = x.reshape(B_, T_ * N1_, H_)
    hf = hidden_state.reshape(B_, T_ * N1_, H_)
    c4 = jnp.concatenate([xf, hf], axis=1).reshape(B_, T_, 2 * N1_, H_)
    smT = jnp.transpose(c4, (2, 0, 1, 3)).reshape(2 * N1_, M_)
    ones = jnp.ones((1, M_), _f32)                      # folds b1 into w1's last column
    slab = jnp.concatenate([feT, smT, ones], axis=0)    # (3*N1+1, M), lane-dense

    # lane-axis grid: 1 block at this size; shards across v7x's 2 TCs for large M
    if M_ > COL_BLOCK_MAX and M_ % COL_BLOCK_MAX == 0:
        cb = COL_BLOCK_MAX
    else:
        cb = M_
    grid = (M_ // cb,)

    out2d = pl.pallas_call(
        lifter_fused_kernel,
        out_shape=jax.ShapeDtypeStruct((N2, M_), _f32),
        grid=grid,
        in_specs=[
            pl.BlockSpec((K, cb), lambda j: (0, j)),            # activation slab
            pl.BlockSpec((2 * HID, K), lambda j: (0, 0)),       # w1 (+b1)
            pl.BlockSpec((HID, HID), lambda j: (0, 0)),         # w2
            pl.BlockSpec((N2, 2 * HID), lambda j: (0, 0)),      # w3
            pl.BlockSpec((HID + N2, 1), lambda j: (0, 0)),      # [b2 ; b3]
        ],
        out_specs=pl.BlockSpec((N2, cb), lambda j: (0, j)),
        compiler_params=pltpu.CompilerParams(dimension_semantics=("parallel",)),
    )(slab, params['w1'], params['w2'], params['w3'], params['b23'])

    # columns are (b, t, h) -> restore the torch output layout (B, T, N2, H)
    return jnp.transpose(out2d.reshape(N2, B_, T_, H_), (1, 2, 0, 3))


# ------------------------------- pure-JAX reference ----------------------------------
def lifter_reference(raw, x, hidden_state):
    """f32 ground truth (explicit HIGHEST matmul precision, scoped to this fn only)."""
    hp = jax.lax.Precision.HIGHEST
    mm = lambda a, b: jnp.matmul(a, b, precision=hp)
    leaky = lambda v: jnp.where(v > 0, v, SLOPE * v)
    B_, T_, N1_, H_ = x.shape
    # image_embed branch
    hs_t = jnp.transpose(hidden_state, (0, 1, 3, 2))                   # (B,T,H,N1)
    h = leaky(mm(hs_t, raw['fe_w1']) + raw['fe_b1'])
    embed = jnp.transpose(mm(h, raw['fe_w2']) + raw['fe_b2'], (0, 1, 3, 2))  # (B,T,N2,H)
    # SpatialMap(x_flat, hidden_flat)
    xf = x.reshape(B_, T_ * N1_, H_)
    hf = hidden_state.reshape(B_, T_ * N1_, H_)
    c = jnp.concatenate([xf, hf], axis=1)
    c = jnp.transpose(c, (0, 2, 1)).reshape(B_, H_, T_, 2 * N1_)
    h = leaky(mm(c, raw['sm_wa']) + raw['sm_ba'])
    h = leaky(mm(h, raw['sm_wb']) + raw['sm_bb'])
    sm = mm(h, raw['sm_wc']) + raw['sm_bc']                            # (B,H,T,N2)
    sm = jnp.transpose(sm, (0, 2, 3, 1))                               # (B,T,N2,H)
    return sm + embed


if __name__ == "__main__":
    key = jax.random.PRNGKey(0)
    kx, kh, kp = jax.random.split(key, 3)
    x = jax.random.normal(kx, (B, T, N1, H), _f32)
    hidden_state = jax.random.normal(kh, (B, T, N1, H), _f32)
    packed, raw = init_params(kp)

    fwd = jax.jit(lifter_forward)
    out = fwd(packed, x, hidden_state)
    jax.block_until_ready(out)

    assert out.shape == (B, T, N2, H) and out.dtype == _f32
    ref = lifter_reference(raw, x, hidden_state)
    # Kernel uses default (single bf16-pass) MXU precision vs. the f32 HIGHEST reference,
    # so the tolerance reflects bf16 truncation, not a logic error.
    np.testing.assert_allclose(np.asarray(out), np.asarray(ref), rtol=1e-2, atol=2e-3)
    print("KERNEL_OK")
</pallas_src>

<mosaic_0001>
module attributes {stable_mosaic.version = 11 : i64} {
  func.func @lifter_fused_kernel(%arg0: i32, %arg1: memref<19x128xf32, #tpu.memory_space<vmem>>, %arg2: memref<128x19xf32, #tpu.memory_space<vmem>>, %arg3: memref<64x64xf32, #tpu.memory_space<vmem>>, %arg4: memref<8x128xf32, #tpu.memory_space<vmem>>, %arg5: memref<72x1xf32, #tpu.memory_space<vmem>>, %arg6: memref<8x128xf32, #tpu.memory_space<vmem>>) attributes {dimension_semantics = [#tpu.dimension_semantics<parallel>], iteration_bounds = array<i64: 1>, scalar_prefetch = 0 : i64, scratch_operands = 0 : i64, tpu.core_type = #tpu.core_type<tc>, window_params = [{transform_indices = @transform_0, window_bounds = array<i64: 19, 128>}, {pipeline_mode = #tpu.pipeline_mode<synchronous>, transform_indices = @transform_1, window_bounds = array<i64: 128, 19>}, {pipeline_mode = #tpu.pipeline_mode<synchronous>, transform_indices = @transform_2, window_bounds = array<i64: 64, 64>}, {pipeline_mode = #tpu.pipeline_mode<synchronous>, transform_indices = @transform_3, window_bounds = array<i64: 8, 128>}, {pipeline_mode = #tpu.pipeline_mode<synchronous>, transform_indices = @transform_4, window_bounds = array<i64: 72, 1>}, {transform_indices = @transform_5, window_bounds = array<i64: 8, 128>}]} {
    %c0 = arith.constant 0 : index
    %c0_0 = arith.constant 0 : index
    %0 = vector.load %arg1[%c0, %c0_0] : memref<19x128xf32, #tpu.memory_space<vmem>>, vector<19x128xf32>
    %c0_1 = arith.constant 0 : index
    %c0_2 = arith.constant 0 : index
    %1 = vector.load %arg2[%c0_1, %c0_2] : memref<128x19xf32, #tpu.memory_space<vmem>>, vector<128x19xf32>
    %cst = arith.constant dense<0.000000e+00> : vector<128x128xf32>
    %2 = tpu.matmul %1, %0, %cst {dimension_numbers = #tpu.dot_dimension_numbers<[1], [0], [0], [1], [0, 0, 1, 1], [], []>} : vector<128x19xf32>, vector<19x128xf32>, vector<128x128xf32> -> vector<128x128xf32>
    %cst_3 = arith.constant 0.000000e+00 : f32
    %3 = vector.broadcast %cst_3 : f32 to vector<128x128xf32>
    %4 = arith.cmpf ogt, %2, %3 : vector<128x128xf32>
    %cst_4 = arith.constant 0.00999999977 : f32
    %5 = vector.broadcast %cst_4 : f32 to vector<128x128xf32>
    %6 = arith.mulf %5, %2 : vector<128x128xf32>
    %7 = arith.select %4, %2, %6 : vector<128x128xi1>, vector<128x128xf32>
    %c0_5 = arith.constant 0 : index
    %c0_6 = arith.constant 0 : index
    %8 = vector.load %arg3[%c0_5, %c0_6] : memref<64x64xf32, #tpu.memory_space<vmem>>, vector<64x64xf32>
    %9 = vector.extract_strided_slice %7 {offsets = [64, 0], sizes = [64, 128], strides = [1, 1]} : vector<128x128xf32> to vector<64x128xf32>
    %cst_7 = arith.constant dense<0.000000e+00> : vector<64x128xf32>
    %10 = tpu.matmul %8, %9, %cst_7 {dimension_numbers = #tpu.dot_dimension_numbers<[1], [0], [0], [1], [0, 0, 1, 1], [], []>} : vector<64x64xf32>, vector<64x128xf32>, vector<64x128xf32> -> vector<64x128xf32>
    %c0_8 = arith.constant 0 : index
    %c0_9 = arith.constant 0 : index
    %11 = vector.load %arg5[%c0_8, %c0_9] : memref<72x1xf32, #tpu.memory_space<vmem>>, vector<64x1xf32>
    %12 = vector.broadcast %11 : vector<64x1xf32> to vector<64x128xf32>
    %13 = arith.addf %10, %12 : vector<64x128xf32>
    %cst_10 = arith.constant 0.000000e+00 : f32
    %14 = vector.broadcast %cst_10 : f32 to vector<64x128xf32>
    %15 = arith.cmpf ogt, %13, %14 : vector<64x128xf32>
    %cst_11 = arith.constant 0.00999999977 : f32
    %16 = vector.broadcast %cst_11 : f32 to vector<64x128xf32>
    %17 = arith.mulf %16, %13 : vector<64x128xf32>
    %18 = arith.select %15, %13, %17 : vector<64x128xi1>, vector<64x128xf32>
    %19 = vector.extract_strided_slice %7 {offsets = [0, 0], sizes = [64, 128], strides = [1, 1]} : vector<128x128xf32> to vector<64x128xf32>
    %20 = tpu.concatenate %19, %18 in 0 : vector<64x128xf32>, vector<64x128xf32> -> vector<128x128xf32>
    %c0_12 = arith.constant 0 : index
    %c0_13 = arith.constant 0 : index
    %21 = vector.load %arg4[%c0_12, %c0_13] : memref<8x128xf32, #tpu.memory_space<vmem>>, vector<8x128xf32>
    %cst_14 = arith.constant dense<0.000000e+00> : vector<8x128xf32>
    %22 = tpu.matmul %21, %20, %cst_14 {dimension_numbers = #tpu.dot_dimension_numbers<[1], [0], [0], [1], [0, 0, 1, 1], [], []>} : vector<8x128xf32>, vector<128x128xf32>, vector<8x128xf32> -> vector<8x128xf32>
    %c64 = arith.constant 64 : index
    %c0_15 = arith.constant 0 : index
    %23 = vector.load %arg5[%c64, %c0_15] : memref<72x1xf32, #tpu.memory_space<vmem>>, vector<8x1xf32>
    %24 = vector.broadcast %23 : vector<8x1xf32> to vector<8x128xf32>
    %25 = arith.addf %22, %24 : vector<8x128xf32>
    %c0_16 = arith.constant 0 : index
    %c0_17 = arith.constant 0 : index
    %26 = vector.load %arg6[%c0_16, %c0_17] : memref<8x128xf32, #tpu.memory_space<vmem>>, vector<8x128xf32>
    tpu.vector_store %arg6[%c0_16, %c0_17], %25 {strides = array<i32>} : memref<8x128xf32, #tpu.memory_space<vmem>>, vector<8x128xf32>,
    return
  }
  func.func @transform_0(%arg0: i32) -> (i32, i32) {
    %c0_i32 = arith.constant 0 : i32
    %c0_i32_0 = arith.constant 0 : i32
    return %c0_i32, %arg0 : i32, i32
  }
  func.func @transform_1(%arg0: i32) -> (i32, i32) {
    %c0_i32 = arith.constant 0 : i32
    %c0_i32_0 = arith.constant 0 : i32
    %c0_i32_1 = arith.constant 0 : i32
    return %c0_i32, %c0_i32_0 : i32, i32
  }
  func.func @transform_2(%arg0: i32) -> (i32, i32) {
    %c0_i32 = arith.constant 0 : i32
    %c0_i32_0 = arith.constant 0 : i32
    %c0_i32_1 = arith.constant 0 : i32
    return %c0_i32, %c0_i32_0 : i32, i32
  }
  func.func @transform_3(%arg0: i32) -> (i32, i32) {
    %c0_i32 = arith.constant 0 : i32
    %c0_i32_0 = arith.constant 0 : i32
    %c0_i32_1 = arith.constant 0 : i32
    return %c0_i32, %c0_i32_0 : i32, i32
  }
  func.func @transform_4(%arg0: i32) -> (i32, i32) {
    %c0_i32 = arith.constant 0 : i32
    %c0_i32_0 = arith.constant 0 : i32
    %c0_i32_1 = arith.constant 0 : i32
    return %c0_i32, %c0_i32_0 : i32, i32
  }
  func.func @transform_5(%arg0: i32) -> (i32, i32) {
    %c0_i32 = arith.constant 0 : i32
    %c0_i32_0 = arith.constant 0 : i32
    return %c0_i32, %arg0 : i32, i32
  }
}

</mosaic_0001>

<bundles_post_ra>
// kernel: lifter_forward.1
= control target key start
LH: loop header
LB: loop body
LE: loop exit
PB: predicated region body
PF: predicated region fallthrough
CT: control target
= control target key end

     0   :  { %vm88_vm0 = vcmask 1042432   ;;  %vm39_vm1 = vcmask 154624   ;;  %v415_v17 = vmov 0   ;;  %vm261_vm10 = vcmask 523264   ;;  %s619_s0 = inlined_call_operand.vmem [shape: f32[19,128], index: 0, kind: input, shape index: {}]   ;;  %s620_s1 = inlined_call_operand.vmem [shape: f32[128,19], index: 1, kind: input, shape index: {}]   ;;  %s621_s4 = inlined_call_operand.vmem [shape: f32[72,1], index: 4, kind: input, shape index: {}]   ;;  %s622_s2 = inlined_call_operand.vmem [shape: f32[64,64], index: 2, kind: input, shape index: {}]   ;;  %s623_s3 = inlined_call_operand.vmem [shape: f32[8,128], index: 3, kind: input, shape index: {}]   ;;  %s624_s5 = inlined_call_operand.vmem [shape: f32[8,128], index: 5, kind: output, shape index: {}]  }
   0x1   :  { %v22_v0 = vld [vmem:[%s619_s0 + $0x10] sm:$0x7]  ;;  %v21_v1 = vld [vmem:[%s619_s0 + $0x8] sm:$0xff]  ;;  %v20_v2 = vld [vmem:[%s619_s0] sm:$0xff]  ;;  %413 = vset.pattern.permute.xlu1 %v415_v17  ;;  %412 = vset.pattern.permute.xlu0 %v415_v17 }
   0x2   :  { %408 = vmatpush.msk.msra.mxu3 %vm88_vm0, %v22_v0  ;;  %383 = vmatpush.msk.msra.mxu0 %vm88_vm0, %v22_v0  ;;  %v31_v3 = vld [vmem:[%s620_s1 + $0x40] sm:$0xff]  ;;  %v32_v4 = vld [vmem:[%s620_s1 + $0x48] sm:$0xff]  ;;  %v33_v5 = vld [vmem:[%s620_s1 + $0x50] sm:$0xff] }
   0x3   :  { %v34_v6 = vld [vmem:[%s620_s1 + $0x58] sm:$0xff]  ;;  %v35_v7 = vld [vmem:[%s620_s1 + $0x60] sm:$0xff]  ;;  %v36_v8 = vld [vmem:[%s620_s1 + $0x68] sm:$0xff]  ;;  %414 = vset.pattern.permute.xlu2 %v415_v17 }
   0x4   :  { %409 = vmatpush.msra.mxu3 %v21_v1  ;;  %106 = vmatpush.msra.mxu0 %v21_v1  ;;  %v37_v9 = vld [vmem:[%s620_s1 + $0x70] sm:$0xff]  ;;  %v38_v10 = vld [vmem:[%s620_s1 + $0x78] sm:$0xff]  ;;  %v218_v16 = vld [vmem:[%s621_s4 + $0x28] sm:$0xff] }
   0x5   :  { %248 = vperm.xlu1 %413, %v218_v16   ;;  %v220_v19 = vld [vmem:[%s621_s4 + $0x38] sm:$0xff]  ;;  %v217_v20 = vld [vmem:[%s621_s4 + $0x20] sm:$0xff]  ;;  %v219_v22 = vld [vmem:[%s621_s4 + $0x30] sm:$0xff] }
   0x6   :  { %410 = vmatpush.msra.mxu3 %v20_v2  ;;  %107 = vmatpush.msra.mxu0 %v20_v2  ;;  %v213_v23 = vld [vmem:[%s621_s4] sm:$0xff]  ;;  %v214_v30 = vld [vmem:[%s621_s4 + $0x8] sm:$0xff]  ;;  %v25_v40 = vld [vmem:[%s620_s1 + $0x10] sm:$0xff] }
   0x7   :  { %392 = vmatmul.msk.f32.vlgmr.msra.gmra.mxu3 %vm39_vm1, %v31_v3  ;;  %258 = vperm.xlu0 %412, %v220_v19   ;;  %v23_v24 = vld [vmem:[%s620_s1] sm:$0xff]  ;;  %v24_v31 = vld [vmem:[%s620_s1 + $0x8] sm:$0xff]  ;;  %v26_v46 = vld [vmem:[%s620_s1 + $0x18] sm:$0xff] }
   0x8   :  { %384 = vmatmul.msk.f32.vlgmr.msra.gmra.mxu0 %vm39_vm1, %v23_v24  ;;  %v205_v44 = vld [vmem:[%s622_s2] sm:$0xff]  ;;  %v206_v47 = vld [vmem:[%s622_s2 + $0x8] sm:$0xff]  ;;  %v216_v48 = vld [vmem:[%s621_s4 + $0x18] sm:$0xff] }
   0x9   :  { %v27_v49 = vld [vmem:[%s620_s1 + $0x20] sm:$0xff]  ;;  %238 = vperm.xlu2 %414, %v216_v48   ;;  %v207_v50 = vld [vmem:[%s622_s2 + $0x10] sm:$0xff]  ;;  %v28_v52 = vld [vmem:[%s620_s1 + $0x28] sm:$0xff] }
   0xa   :  { %v215_v51 = vld [vmem:[%s621_s4 + $0x10] sm:$0xff]  ;;  %v208_v53 = vld [vmem:[%s622_s2 + $0x18] sm:$0xff]  ;;  %v352_v55 = vld [vmem:[%s621_s4 + $0x40] sm:$0xff] }
   0xb   :  { %v29_v54 = vld [vmem:[%s620_s1 + $0x30] sm:$0xff]  ;;  %v209_v56 = vld [vmem:[%s622_s2 + $0x20] sm:$0xff]  ;;  %v30_v57 = vld [vmem:[%s620_s1 + $0x38] sm:$0xff] }
   0xc   :  { %v210_v58 = vld [vmem:[%s622_s2 + $0x28] sm:$0xff]  ;;  %v211_v59 = vld [vmem:[%s622_s2 + $0x30] sm:$0xff]  ;;  %v212_v60 = vld [vmem:[%s622_s2 + $0x38] sm:$0xff] }
   0xd   :  { %243 = vperm.xlu1 %413, %v217_v20  }
   0xf   :  { %393 = vmatmul.msk.f32.gmra.mxu3 %vm39_vm1, %v32_v4  ;;  %253 = vperm.xlu0 %412, %v219_v22  }
  0x10   :  { %385 = vmatmul.msk.f32.gmra.mxu0 %vm39_vm1, %v24_v31 }
  0x11   :  { %233 = vperm.xlu2 %414, %v215_v51  }
  0x15   :  { %223 = vperm.xlu1 %413, %v213_v23  }
  0x17   :  { %394 = vmatmul.msk.f32.gmra.mxu3 %vm39_vm1, %v33_v5  ;;  %228 = vperm.xlu0 %412, %v214_v30  }
  0x18   :  { %386 = vmatmul.msk.f32.gmra.mxu0 %vm39_vm1, %v25_v40 }
  0x19   :  { %355 = vperm.xlu2 %414, %v352_v55  }
  0x1f   :  { %395 = vmatmul.msk.f32.gmra.mxu3 %vm39_vm1, %v34_v6 }
  0x20   :  { %387 = vmatmul.msk.f32.gmra.mxu0 %vm39_vm1, %v26_v46 }
  0x27   :  { %396 = vmatmul.msk.f32.gmra.mxu3 %vm39_vm1, %v35_v7 }
  0x28   :  { %388 = vmatmul.msk.f32.gmra.mxu0 %vm39_vm1, %v27_v49 }
  0x2f   :  { %397 = vmatmul.msk.f32.gmra.mxu3 %vm39_vm1, %v36_v8 }
  0x30   :  { %389 = vmatmul.msk.f32.gmra.mxu0 %vm39_vm1, %v28_v52 }
  0x37   :  { %398 = vmatmul.msk.f32.gmra.mxu3 %vm39_vm1, %v37_v9 }
  0x38   :  { %390 = vmatmul.msk.f32.gmra.mxu0 %vm39_vm1, %v29_v54 }
  0x3f   :  { %399 = vmatmul.msk.f32.gmra.mxu3 %vm39_vm1, %v38_v10 }
  0x40   :  { %391 = vmatmul.msk.f32.gmra.mxu0 %vm39_vm1, %v30_v57 }
  0x77   :  { %v249_v9 = vpop.permute.xlu1 %248 }
  0x79   :  { %v259_v8 = vpop.permute.xlu0 %258 }
  0x85   :  { %v583_v62 = vpop.f32.mrf.mxu0 }
  0x86   :  { %v173_v57 = vmul.f32 0.01, %v583_v62 }
  0x8a   :  { %v487_v11 = vpop.f32.mrf.mxu3 }
  0x8b   :  { %v181_v41 = vmul.f32 0.01, %v487_v11  ;;  %vm165_vm9 = vcmp.gt.f32.partialorder %v487_v11, 0.0 }
  0x8d   :  { %v197_v45 = vsel %vm165_vm9, %v487_v11, %v181_v41  ;;  %v585_v0 = vpop.f32.mrf.mxu0  ;;  %v239_v11 = vpop.permute.xlu2 %238 }
  0x8e   :  { %v174_v55 = vmul.f32 0.01, %v585_v0  ;;  %vm158_vm9 = vcmp.gt.f32.partialorder %v585_v0, 0.0 }
  0x92   :  { %v136_v12 = vpop.f32.mrf.mxu3 }
  0x93   :  { %v182_v38 = vmul.f32 0.01, %v136_v12  ;;  %vm166_vm8 = vcmp.gt.f32.partialorder %v136_v12, 0.0 }
  0x95   :  { %v198_v43 = vsel %vm166_vm8, %v136_v12, %v182_v38  ;;  %v587_v2 = vpop.f32.mrf.mxu0  ;;  %v234_v22 = vpop.permute.xlu2 %233 }
  0x96   :  { %vm159_vm8 = vcmp.gt.f32.partialorder %v587_v2, 0.0 }
  0x9a   :  { %v139_v13 = vpop.f32.mrf.mxu3 }
  0x9b   :  { %v183_v36 = vmul.f32 0.01, %v139_v13  ;;  %vm167_vm7 = vcmp.gt.f32.partialorder %v139_v13, 0.0 }
  0x9d   :  { %v199_v42 = vsel %vm167_vm7, %v139_v13, %v183_v36  ;;  %v589_v4 = vpop.f32.mrf.mxu0  ;;  %v254_v13 = vpop.permute.xlu0 %253 }
  0x9e   :  { %v176_v51 = vmul.f32 0.01, %v589_v4  ;;  %vm160_vm7 = vcmp.gt.f32.partialorder %v589_v4, 0.0 }
  0xa2   :  { %v142_v14 = vpop.f32.mrf.mxu3 }
  0xa3   :  { %v184_v34 = vmul.f32 0.01, %v142_v14  ;;  %vm168_vm6 = vcmp.gt.f32.partialorder %v142_v14, 0.0 }
  0xa5   :  { %v200_v39 = vsel %vm168_vm6, %v142_v14, %v184_v34  ;;  %v591_v7 = vpop.f32.mrf.mxu0  ;;  %v244_v14 = vpop.permute.xlu1 %243 }
  0xa6   :  { %v177_v49 = vmul.f32 0.01, %v591_v7  ;;  %vm161_vm6 = vcmp.gt.f32.partialorder %v591_v7, 0.0 }
  0xa8   :  { %v193_v54 = vsel %vm161_vm6, %v591_v7, %v177_v49 }
  0xaa   :  { %v145_v15 = vpop.f32.mrf.mxu3 }
  0xab   :  { %v185_v32 = vmul.f32 0.01, %v145_v15  ;;  %vm169_vm5 = vcmp.gt.f32.partialorder %v145_v15, 0.0 }
  0xad   :  { %v201_v37 = vsel %vm169_vm5, %v145_v15, %v185_v32  ;;  %v593_v12 = vpop.f32.mrf.mxu0  ;;  %v224_v31 = vpop.permute.xlu1 %223 }
  0xae   :  { %vm162_vm5 = vcmp.gt.f32.partialorder %v593_v12, 0.0 }
  0xb2   :  { %v148_v18 = vpop.f32.mrf.mxu3 }
  0xb3   :  { %v186_v28 = vmul.f32 0.01, %v148_v18  ;;  %vm170_vm4 = vcmp.gt.f32.partialorder %v148_v18, 0.0 }
  0xb5   :  { %v202_v35 = vsel %vm170_vm4, %v148_v18, %v186_v28  ;;  %v127_v23 = vpop.f32.mrf.mxu0 }
  0xb6   :  { %vm163_vm4 = vcmp.gt.f32.partialorder %v127_v23, 0.0 }
  0xba   :  { %v151_v21 = vpop.f32.mrf.mxu3 }
  0xbb   :  { %v187_v26 = vmul.f32 0.01, %v151_v21  ;;  %vm171_vm3 = vcmp.gt.f32.partialorder %v151_v21, 0.0 }
  0xbd   :  { %v203_v33 = vsel %vm171_vm3, %v151_v21, %v187_v26  ;;  %v130_v40 = vpop.f32.mrf.mxu0 }
  0xbe   :  { %vm164_vm3 = vcmp.gt.f32.partialorder %v130_v40, 0.0 }
  0xc2   :  { %v154_v25 = vpop.f32.mrf.mxu3 }
  0xc3   :  { %vm172_vm2 = vcmp.gt.f32.partialorder %v154_v25, 0.0  ;;  %v188_v27 = vmul.f32 0.01, %v154_v25 }
  0xc5   :  { %v204_v29 = vsel %vm172_vm2, %v154_v25, %v188_v27  ;;  %v229_v27 = vpop.permute.xlu0 %228 }
  0xc6   :  { %294 = vmatpush.msra.mxu1 %v204_v29 }
  0xc8   :  { %295 = vmatpush.msra.mxu1 %v203_v33 }
  0xca   :  { %296 = vmatpush.msra.mxu1 %v202_v35 }
  0xcc   :  { %297 = vmatpush.msra.mxu1 %v201_v37 }
  0xce   :  { %298 = vmatpush.msra.mxu1 %v200_v39 }
  0xd0   :  { %299 = vmatpush.msra.mxu1 %v199_v42 }
  0xd2   :  { %300 = vmatpush.msra.mxu1 %v198_v43  ;;  %v180_v43 = vmul.f32 0.01, %v130_v40 }
  0xd4   :  { %301 = vmatpush.msra.mxu1 %v197_v45  ;;  %v179_v45 = vmul.f32 0.01, %v127_v23  ;;  %v196_v48 = vsel %vm164_vm3, %v130_v40, %v180_v43 }
  0xd5   :  { %400 = vmatmul.msk.f32.vlgmr.msra.gmra.mxu1 %vm261_vm10, %v205_v44 }
  0xdd   :  { %401 = vmatmul.msk.f32.gmra.mxu1 %vm261_vm10, %v206_v47  ;;  %v178_v47 = vmul.f32 0.01, %v593_v12 }
  0xdf   :  { %v194_v52 = vsel %vm162_vm5, %v593_v12, %v178_v47 }
  0xe5   :  { %402 = vmatmul.msk.f32.gmra.mxu1 %vm261_vm10, %v207_v50  ;;  %v195_v50 = vsel %vm163_vm4, %v127_v23, %v179_v45 }
  0xed   :  { %403 = vmatmul.msk.f32.gmra.mxu1 %vm261_vm10, %v208_v53  ;;  %v175_v53 = vmul.f32 0.01, %v587_v2 }
  0xf5   :  { %404 = vmatmul.msk.f32.gmra.mxu1 %vm261_vm10, %v209_v56  ;;  %v192_v56 = vsel %vm160_vm7, %v589_v4, %v176_v51 }
  0xfd   :  { %405 = vmatmul.msk.f32.gmra.mxu1 %vm261_vm10, %v210_v58  ;;  %v191_v58 = vsel %vm159_vm8, %v587_v2, %v175_v53 }
 0x105   :  { %406 = vmatmul.msk.f32.gmra.mxu1 %vm261_vm10, %v211_v59  ;;  %v190_v59 = vsel %vm158_vm9, %v585_v0, %v174_v55 }
 0x10d   :  { %407 = vmatmul.msk.f32.gmra.mxu1 %vm261_vm10, %v212_v60  ;;  %vm157_vm10 = vcmp.gt.f32.partialorder %v583_v62, 0.0  ;;  %v351_v60 = vld [vmem:[%s623_s3] sm:$0xff] }
 0x152   :  { %v303_v61 = vpop.f32.mrf.mxu1 }
 0x153   :  { %v304_v35 = vadd.f32 %v303_v61, %v224_v31  ;;  %v189_v61 = vsel %vm157_vm10, %v583_v62, %v173_v57 }
 0x155   :  { %v335_v42 = vmul.f32 0.01, %v304_v35  ;;  %vm327_vm2 = vcmp.gt.f32.partialorder %v304_v35, 0.0 }
 0x157   :  { %v343_v46 = vsel %vm327_vm2, %v304_v35, %v335_v42 }
 0x15a   :  { %v306_v63 = vpop.f32.mrf.mxu1 }
 0x15b   :  { %v307_v32 = vadd.f32 %v306_v63, %v229_v27  ;;  %v356_v63 = vpop.permute.xlu2 %355 }
 0x15d   :  { %v336_v39 = vmul.f32 0.01, %v307_v32  ;;  %vm328_vm1 = vcmp.gt.f32.partialorder %v307_v32, 0.0 }
 0x15f   :  { %v344_v44 = vsel %vm328_vm1, %v307_v32, %v336_v39 }
 0x162   :  { %v309_v1 = vpop.f32.mrf.mxu1 }
 0x163   :  { %v310_v28 = vadd.f32 %v309_v1, %v234_v22 }
 0x165   :  { %v337_v37 = vmul.f32 0.01, %v310_v28  ;;  %vm329_vm0 = vcmp.gt.f32.partialorder %v310_v28, 0.0 }
 0x167   :  { %v345_v41 = vsel %vm329_vm0, %v310_v28, %v337_v37 }
 0x16a   :  { %v312_v3 = vpop.f32.mrf.mxu1 }
 0x16b   :  { %v313_v24 = vadd.f32 %v312_v3, %v239_v11 }
 0x16d   :  { %v338_v34 = vmul.f32 0.01, %v313_v24  ;;  %vm330_vm15 = vcmp.gt.f32.partialorder %v313_v24, 0.0 }
 0x16f   :  { %v346_v38 = vsel %vm330_vm15, %v313_v24, %v338_v34 }
 0x172   :  { %v315_v5 = vpop.f32.mrf.mxu1 }
 0x173   :  { %v316_v19 = vadd.f32 %v315_v5, %v244_v14 }
 0x175   :  { %v339_v30 = vmul.f32 0.01, %v316_v19  ;;  %vm331_vm14 = vcmp.gt.f32.partialorder %v316_v19, 0.0 }
 0x177   :  { %v347_v36 = vsel %vm331_vm14, %v316_v19, %v339_v30 }
 0x17a   :  { %v318_v6 = vpop.f32.mrf.mxu1 }
 0x17b   :  { %v319_v17 = vadd.f32 %v318_v6, %v249_v9 }
 0x17d   :  { %v340_v26 = vmul.f32 0.01, %v319_v17  ;;  %vm332_vm13 = vcmp.gt.f32.partialorder %v319_v17, 0.0 }
 0x17f   :  { %v348_v33 = vsel %vm332_vm13, %v319_v17, %v340_v26 }
 0x182   :  { %v321_v10 = vpop.f32.mrf.mxu1 }
 0x183   :  { %v322_v15 = vadd.f32 %v321_v10, %v254_v13 }
 0x185   :  { %v341_v21 = vmul.f32 0.01, %v322_v15  ;;  %vm333_vm12 = vcmp.gt.f32.partialorder %v322_v15, 0.0 }
 0x187   :  { %v349_v29 = vsel %vm333_vm12, %v322_v15, %v341_v21 }
 0x18a   :  { %v324_v16 = vpop.f32.mrf.mxu1 }
 0x18b   :  { %v325_v18 = vadd.f32 %v324_v16, %v259_v8 }
 0x18d   :  { %vm334_vm11 = vcmp.gt.f32.partialorder %v325_v18, 0.0  ;;  %v342_v20 = vmul.f32 0.01, %v325_v18 }
 0x18f   :  { %v350_v25 = vsel %vm334_vm11, %v325_v18, %v342_v20 }
 0x190   :  { %358 = vmatpush.msra.mxu2 %v350_v25 }
 0x192   :  { %359 = vmatpush.msra.mxu2 %v349_v29 }
 0x194   :  { %360 = vmatpush.msra.mxu2 %v348_v33 }
 0x196   :  { %361 = vmatpush.msra.mxu2 %v347_v36 }
 0x198   :  { %362 = vmatpush.msra.mxu2 %v346_v38 }
 0x19a   :  { %363 = vmatpush.msra.mxu2 %v345_v41 }
 0x19c   :  { %364 = vmatpush.msra.mxu2 %v344_v44 }
 0x19e   :  { %365 = vmatpush.msra.mxu2 %v343_v46 }
 0x1a0   :  { %366 = vmatpush.msra.mxu2 %v196_v48 }
 0x1a2   :  { %367 = vmatpush.msra.mxu2 %v195_v50 }
 0x1a4   :  { %368 = vmatpush.msra.mxu2 %v194_v52 }
 0x1a6   :  { %369 = vmatpush.msra.mxu2 %v193_v54 }
 0x1a8   :  { %370 = vmatpush.msra.mxu2 %v192_v56 }
 0x1aa   :  { %371 = vmatpush.msra.mxu2 %v191_v58 }
 0x1ac   :  { %372 = vmatpush.msra.mxu2 %v190_v59 }
 0x1ae   :  { %373 = vmatpush.msra.mxu2 %v189_v61 }
 0x1af   :  { %374 = vmatmul.f32.vlgmr.msra.gmra.mxu2 %v351_v60 }
 0x232   :  { %v375_v1 = vpop.f32.mrf.mxu2 }
 0x233   :  { %v376_v3 = vadd.f32 %v375_v1, %v356_v63 }
 0x235   :  { %378 = vst [vmem:[%s624_s5] sm:$0xff] %v376_v3 }

</bundles_post_ra>
